<compile_context>
chip_gen: v6e
topology: v6e:2x2x1
jax: 0.10.0
libtpu: 0.0.40
codegen_flags: <defaults>
</compile_context>

<pallas_src>
import functools

import jax
import jax.numpy as jnp
from jax import lax
from jax.experimental import pallas as pl
from jax.experimental.pallas import tpu as pltpu


def _round_up(x, m):
    return ((x + m - 1) // m) * m


def _gelu_exact(x):
    # PyTorch nn.GELU() default: exact erf-based GELU.
    return 0.5 * x * (1.0 + lax.erf(x * (1.0 / jnp.sqrt(2.0).astype(x.dtype))))


def mlp_kernel(x_ref, w1_ref, b1_ref, w2_ref, b2_ref, o_ref):
    # fc1: (TB, Dp) @ (Dp, Hp) + (1, Hp)   -- f32 MXU accumulation
    h = jnp.dot(x_ref[...], w1_ref[...], preferred_element_type=jnp.float32)
    h = h + b1_ref[...]
    # activation (exact GELU, matching torch default) -> EUP erf, runs off the MXU slot
    h = _gelu_exact(h)
    # fc2: (TB, Hp) @ (Hp, Op) + (1, Op)
    out = jnp.dot(h.astype(w2_ref.dtype), w2_ref[...],
                  preferred_element_type=jnp.float32)
    out = out + b2_ref[...]
    o_ref[...] = out.astype(o_ref.dtype)


def _maybe_pad(a, pads):
    if all(p == (0, 0) for p in pads):
        return a
    return jnp.pad(a, pads)


@functools.partial(jax.jit, static_argnames=("block_b",))
def mlp_forward(x, w1, b1, w2, b2, *, block_b=512):
    B, D = x.shape
    H = w1.shape[1]
    O = w2.shape[1]
    itemsize = jnp.dtype(x.dtype).itemsize

    # --- lane-dense padding (zero padding keeps results bit-identical) ---
    Dp = _round_up(D, 128)
    Hp = _round_up(H, 128)
    Op = _round_up(O, 128)

    # --- adaptive batch tile: multiple of 8 sublanes, capped so everything fits VMEM ---
    # Budget: resident weights/biases + 2x double-buffered x & out tiles + f32 intermediate h.
    vmem_budget = 28 * 1024 * 1024
    resident = (Dp * Hp + Hp * Op + Hp + Op) * itemsize
    per_row = (2 * (Dp + Op)) * itemsize + Hp * 4  # double-buffered io rows + f32 h row
    max_tb = max(8, ((vmem_budget - resident) // max(per_row, 1)) // 8 * 8)
    TB = min(block_b, _round_up(B, 8), max_tb)
    Bp = _round_up(B, TB)
    n_tiles = Bp // TB

    x_p = _maybe_pad(x, ((0, Bp - B), (0, Dp - D)))
    w1_p = _maybe_pad(w1, ((0, Dp - D), (0, Hp - H)))
    b1_p = _maybe_pad(b1, ((0, 0), (0, Hp - H)))
    w2_p = _maybe_pad(w2, ((0, Hp - H), (0, Op - O)))
    b2_p = _maybe_pad(b2, ((0, 0), (0, Op - O)))

    # --- VMEM limit: double-buffered x/out tiles + resident weights/biases + headroom ---
    needed = resident + TB * per_row + 2 * TB * Hp * itemsize
    vmem_limit = int(min(max(2 * needed, 32 * 1024 * 1024), 48 * 1024 * 1024))

    cost = pl.CostEstimate(
        flops=2 * Bp * Dp * Hp + 2 * Bp * Hp * Op,
        transcendentals=Bp * Hp,
        bytes_accessed=(Bp * Dp + Bp * Op + Dp * Hp + Hp * Op + Hp + Op) * itemsize,
    )

    out_p = pl.pallas_call(
        mlp_kernel,
        out_shape=jax.ShapeDtypeStruct((Bp, Op), x.dtype),
        grid_spec=pltpu.PrefetchScalarGridSpec(
            num_scalar_prefetch=0,
            grid=(n_tiles,),
            in_specs=[
                pl.BlockSpec((TB, Dp), lambda i: (i, 0)),   # x tile: pipelined over batch
                pl.BlockSpec((Dp, Hp), lambda i: (0, 0)),   # w1: resident
                pl.BlockSpec((1, Hp), lambda i: (0, 0)),    # b1: resident
                pl.BlockSpec((Hp, Op), lambda i: (0, 0)),   # w2: resident
                pl.BlockSpec((1, Op), lambda i: (0, 0)),    # b2: resident
            ],
            out_specs=pl.BlockSpec((TB, Op), lambda i: (i, 0)),
        ),
        compiler_params=pltpu.CompilerParams(
            dimension_semantics=("parallel",),   # megacore sharding on v7x
            vmem_limit_bytes=vmem_limit,
        ),
        cost_estimate=cost,
    )(x_p, w1_p, b1_p, w2_p, b2_p)

    return out_p[:B, :O]


def init_mlp_params(key, input_dim, output_dim, dtype=jnp.float32):
    """Deterministic init matching nn.Linear shapes:
       fc1: (input_dim -> input_dim//4), fc2: (input_dim//4 -> output_dim)."""
    hidden = input_dim // 4
    k1, k2, k3, k4 = jax.random.split(key, 4)
    # PyTorch nn.Linear default: U(-1/sqrt(fan_in), 1/sqrt(fan_in))
    lim1 = 1.0 / jnp.sqrt(jnp.float32(input_dim))
    lim2 = 1.0 / jnp.sqrt(jnp.float32(hidden))
    w1 = jax.random.uniform(k1, (input_dim, hidden), dtype, -lim1, lim1)
    b1 = jax.random.uniform(k2, (1, hidden), dtype, -lim1, lim1)
    w2 = jax.random.uniform(k3, (hidden, output_dim), dtype, -lim2, lim2)
    b2 = jax.random.uniform(k4, (1, output_dim), dtype, -lim2, lim2)
    return w1, b1, w2, b2


def mlp_reference(x, w1, b1, w2, b2):
    h = x @ w1 + b1
    h = 0.5 * h * (1.0 + lax.erf(h / jnp.sqrt(2.0)))
    return h @ w2 + b2


if __name__ == "__main__":
    key = jax.random.PRNGKey(0)
    kx, kp = jax.random.split(key)

    batch = 8
    input_dim = 128      # -> hidden = 32
    output_dim = 64

    x = jax.random.normal(kx, (batch, input_dim), jnp.float32)
    w1, b1, w2, b2 = init_mlp_params(kp, input_dim, output_dim)

    out = mlp_forward(x, w1, b1, w2, b2)
    out = jax.block_until_ready(out)

    ref = mlp_reference(x, w1, b1, w2, b2)
    assert out.shape == (batch, output_dim)
    assert jnp.allclose(out, ref, atol=1e-5, rtol=1e-5), "mismatch vs reference"

    print("KERNEL_OK")
</pallas_src>

<mosaic_0001>
module attributes {stable_mosaic.version = 11 : i64} {
  func.func @mlp_kernel(%arg0: i32, %arg1: memref<8x128xf32, #tpu.memory_space<vmem>>, %arg2: memref<128x128xf32, #tpu.memory_space<vmem>>, %arg3: memref<1x128xf32, #tpu.memory_space<vmem>>, %arg4: memref<128x128xf32, #tpu.memory_space<vmem>>, %arg5: memref<1x128xf32, #tpu.memory_space<vmem>>, %arg6: memref<8x128xf32, #tpu.memory_space<vmem>>) attributes {dimension_semantics = [#tpu.dimension_semantics<parallel>], iteration_bounds = array<i64: 1>, scalar_prefetch = 0 : i64, scratch_operands = 0 : i64, tpu.core_type = #tpu.core_type<tc>, window_params = [{transform_indices = @transform_0, window_bounds = array<i64: 8, 128>}, {pipeline_mode = #tpu.pipeline_mode<synchronous>, transform_indices = @transform_1, window_bounds = array<i64: 128, 128>}, {pipeline_mode = #tpu.pipeline_mode<synchronous>, transform_indices = @transform_2, window_bounds = array<i64: 1, 128>}, {pipeline_mode = #tpu.pipeline_mode<synchronous>, transform_indices = @transform_3, window_bounds = array<i64: 128, 128>}, {pipeline_mode = #tpu.pipeline_mode<synchronous>, transform_indices = @transform_4, window_bounds = array<i64: 1, 128>}, {transform_indices = @transform_5, window_bounds = array<i64: 8, 128>}]} {
    %c0 = arith.constant 0 : index
    %c0_0 = arith.constant 0 : index
    %0 = vector.load %arg1[%c0, %c0_0] : memref<8x128xf32, #tpu.memory_space<vmem>>, vector<8x128xf32>
    %c0_1 = arith.constant 0 : index
    %c0_2 = arith.constant 0 : index
    %1 = vector.load %arg2[%c0_1, %c0_2] : memref<128x128xf32, #tpu.memory_space<vmem>>, vector<128x128xf32>
    %cst = arith.constant dense<0.000000e+00> : vector<8x128xf32>
    %2 = tpu.matmul %0, %1, %cst {dimension_numbers = #tpu.dot_dimension_numbers<[1], [0], [0], [1], [0, 0, 1, 1], [], []>} : vector<8x128xf32>, vector<128x128xf32>, vector<8x128xf32> -> vector<8x128xf32>
    %c0_3 = arith.constant 0 : index
    %c0_4 = arith.constant 0 : index
    %3 = vector.load %arg3[%c0_3, %c0_4] : memref<1x128xf32, #tpu.memory_space<vmem>>, vector<1x128xf32>
    %4 = vector.broadcast %3 : vector<1x128xf32> to vector<8x128xf32>
    %5 = arith.addf %2, %4 : vector<8x128xf32>
    %cst_5 = arith.constant 5.000000e-01 : f32
    %6 = vector.broadcast %cst_5 : f32 to vector<8x128xf32>
    %7 = arith.mulf %6, %5 : vector<8x128xf32>
    %cst_6 = arith.constant 2.000000e+00 : f32
    %8 = math.sqrt %cst_6 : f32
    %cst_7 = arith.constant 1.000000e+00 : f32
    %9 = arith.divf %cst_7, %8 : f32
    %10 = vector.broadcast %9 : f32 to vector<8x128xf32>
    %11 = arith.mulf %5, %10 : vector<8x128xf32>
    %12 = math.erf %11 : vector<8x128xf32>
    %cst_8 = arith.constant 1.000000e+00 : f32
    %13 = vector.broadcast %cst_8 : f32 to vector<8x128xf32>
    %14 = arith.addf %13, %12 : vector<8x128xf32>
    %15 = arith.mulf %7, %14 : vector<8x128xf32>
    %c0_9 = arith.constant 0 : index
    %c0_10 = arith.constant 0 : index
    %16 = vector.load %arg4[%c0_9, %c0_10] : memref<128x128xf32, #tpu.memory_space<vmem>>, vector<128x128xf32>
    %cst_11 = arith.constant dense<0.000000e+00> : vector<8x128xf32>
    %17 = tpu.matmul %15, %16, %cst_11 {dimension_numbers = #tpu.dot_dimension_numbers<[1], [0], [0], [1], [0, 0, 1, 1], [], []>} : vector<8x128xf32>, vector<128x128xf32>, vector<8x128xf32> -> vector<8x128xf32>
    %c0_12 = arith.constant 0 : index
    %c0_13 = arith.constant 0 : index
    %18 = vector.load %arg5[%c0_12, %c0_13] : memref<1x128xf32, #tpu.memory_space<vmem>>, vector<1x128xf32>
    %19 = vector.broadcast %18 : vector<1x128xf32> to vector<8x128xf32>
    %20 = arith.addf %17, %19 : vector<8x128xf32>
    %c0_14 = arith.constant 0 : index
    %c0_15 = arith.constant 0 : index
    %21 = vector.load %arg6[%c0_14, %c0_15] : memref<8x128xf32, #tpu.memory_space<vmem>>, vector<8x128xf32>
    tpu.vector_store %arg6[%c0_14, %c0_15], %20 {strides = array<i32>} : memref<8x128xf32, #tpu.memory_space<vmem>>, vector<8x128xf32>,
    return
  }
  func.func @transform_0(%arg0: i32) -> (i32, i32) {
    %c0_i32 = arith.constant 0 : i32
    %c0_i32_0 = arith.constant 0 : i32
    return %arg0, %c0_i32 : i32, i32
  }
  func.func @transform_1(%arg0: i32) -> (i32, i32) {
    %c0_i32 = arith.constant 0 : i32
    %c0_i32_0 = arith.constant 0 : i32
    %c0_i32_1 = arith.constant 0 : i32
    return %c0_i32, %c0_i32_0 : i32, i32
  }
  func.func @transform_2(%arg0: i32) -> (i32, i32) {
    %c0_i32 = arith.constant 0 : i32
    %c0_i32_0 = arith.constant 0 : i32
    %c0_i32_1 = arith.constant 0 : i32
    return %c0_i32, %c0_i32_0 : i32, i32
  }
  func.func @transform_3(%arg0: i32) -> (i32, i32) {
    %c0_i32 = arith.constant 0 : i32
    %c0_i32_0 = arith.constant 0 : i32
    %c0_i32_1 = arith.constant 0 : i32
    return %c0_i32, %c0_i32_0 : i32, i32
  }
  func.func @transform_4(%arg0: i32) -> (i32, i32) {
    %c0_i32 = arith.constant 0 : i32
    %c0_i32_0 = arith.constant 0 : i32
    %c0_i32_1 = arith.constant 0 : i32
    return %c0_i32, %c0_i32_0 : i32, i32
  }
  func.func @transform_5(%arg0: i32) -> (i32, i32) {
    %c0_i32 = arith.constant 0 : i32
    %c0_i32_0 = arith.constant 0 : i32
    return %arg0, %c0_i32 : i32, i32
  }
}

</mosaic_0001>

<bundles_post_ra>
// kernel: mlp_forward.1
= control target key start
LH: loop header
LB: loop body
LE: loop exit
PB: predicated region body
PF: predicated region fallthrough
CT: control target
= control target key end

     0   :  { %v361_v1 = vmov 0.0   ;;  %vm362_vm0 = vmmov 0   ;;  %s536_s0 = inlined_call_operand.vmem [shape: f32[8,128], index: 0, kind: input, shape index: {}]   ;;  %s537_s1 = inlined_call_operand.vmem [shape: f32[128,128], index: 1, kind: input, shape index: {}]   ;;  %s538_s2 = inlined_call_operand.vmem [shape: f32[1,128], index: 2, kind: input, shape index: {}]   ;;  %s539_s3 = inlined_call_operand.vmem [shape: f32[128,128], index: 3, kind: input, shape index: {}]   ;;  %s540_s4 = inlined_call_operand.vmem [shape: f32[1,128], index: 4, kind: input, shape index: {}]   ;;  %s541_s5 = inlined_call_operand.hbm [shape: f32[8,128], index: 5, kind: output, shape index: {}]  }
   0x1   :  { %v37_v0 = vld [vmem:[%s537_s1 + $0x78] sm:$0xff]  ;;  %264 = vmatprep.subr.mxu0 %v361_v1  ;;  %v36_v2 = vld [vmem:[%s537_s1 + $0x70] sm:$0xff]  ;;  %296 = vmatprep.mubr.msk.f32.mxu0 %vm362_vm0, %v361_v1  ;;  %v35_v3 = vld [vmem:[%s537_s1 + $0x68] sm:$0xff] }
   0x2   :  { %265 = vmatpush3.msra.mxu0 %v37_v0  ;;  %299 = vmatprep.subr.mxu1 %v361_v1  ;;  %v34_v4 = vld [vmem:[%s537_s1 + $0x60] sm:$0xff]  ;;  %v135_v5 = vld [vmem:[%s539_s3 + $0x78] sm:$0xff]  ;;  %v134_v6 = vld [vmem:[%s539_s3 + $0x70] sm:$0xff] }
   0x3   :  { %266 = vmatprep.subr.mxu0 %v361_v1  ;;  %331 = vmatprep.mubr.msk.f32.mxu1 %vm362_vm0, %v361_v1  ;;  %v33_v7 = vld [vmem:[%s537_s1 + $0x58] sm:$0xff]  ;;  %v133_v8 = vld [vmem:[%s539_s3 + $0x68] sm:$0xff] }
   0x4   :  { %267 = vmatpush3.msra.mxu0 %v36_v2  ;;  %300 = vmatpush3.msra.mxu1 %v135_v5 }
   0x5   :  { %268 = vmatprep.subr.mxu0 %v361_v1  ;;  %301 = vmatprep.subr.mxu1 %v361_v1 }
   0x6   :  { %269 = vmatpush3.msra.mxu0 %v35_v3 }
   0x7   :  { %270 = vmatprep.subr.mxu0 %v361_v1 }
   0x8   :  { %10 = vsyncpa [#allocation3], 0  ;;  %271 = vmatpush3.msra.mxu0 %v34_v4  ;;  %302 = vmatpush3.msra.mxu1 %v134_v6  ;;  %v32_v9 = vld [vmem:[%s537_s1 + $0x50] sm:$0xff]  ;;  %v132_v10 = vld [vmem:[%s539_s3 + $0x60] sm:$0xff]  ;;  %s363_s10 = smov [#allocation2]  }
   0x9   :  { %272 = vmatprep.subr.mxu0 %v361_v1  ;;  %303 = vmatprep.subr.mxu1 %v361_v1  ;;  %v31_v11 = vld [vmem:[%s537_s1 + $0x48] sm:$0xff]  ;;  %v30_v12 = vld [vmem:[%s537_s1 + $0x40] sm:$0xff]  ;;  %v29_v13 = vld [vmem:[%s537_s1 + $0x38] sm:$0xff]  ;;  %s220_s11 = sshll.u32 %s363_s10, 4  ;;  %s221_s11 = int_to_ptr.vmem [resolvable:$true] %s220_s11 }
   0xa   :  { %273 = vmatpush3.msra.mxu0 %v33_v7  ;;  %304 = vmatpush3.msra.mxu1 %v133_v8  ;;  %v28_v14 = vld [vmem:[%s537_s1 + $0x30] sm:$0xff]  ;;  %v27_v15 = vld [vmem:[%s537_s1 + $0x28] sm:$0xff]  ;;  %v26_v16 = vld [vmem:[%s537_s1 + $0x20] sm:$0xff]  ;;  %p344_p1 = scmp.lt.s32.totalorder %s221_s11, %s221_s11 }
   0xb   :  { %274 = vmatprep.subr.mxu0 %v361_v1  ;;  %305 = vmatprep.subr.mxu1 %v361_v1  ;;  %v25_v17 = vld [vmem:[%s537_s1 + $0x18] sm:$0xff]  ;;  %v24_v18 = vld [vmem:[%s537_s1 + $0x10] sm:$0xff]  ;;  %v23_v19 = vld [vmem:[%s537_s1 + $0x8] sm:$0xff] }
   0xc   :  { %275 = vmatpush3.msra.mxu0 %v32_v9  ;;  %306 = vmatpush3.msra.mxu1 %v132_v10  ;;  %v22_v20 = vld [vmem:[%s537_s1] sm:$0xff]  ;;  %v131_v22 = vld [vmem:[%s539_s3 + $0x58] sm:$0xff]  ;;  %v130_v23 = vld [vmem:[%s539_s3 + $0x50] sm:$0xff] }
   0xd   :  { %276 = vmatprep.subr.mxu0 %v361_v1  ;;  %307 = vmatprep.subr.mxu1 %v361_v1  ;;  %v21_v21 = vld [vmem:[%s536_s0] sm:$0xff]  ;;  %v129_v24 = vld [vmem:[%s539_s3 + $0x48] sm:$0xff]  ;;  %v127_v26 = vld [vmem:[%s539_s3 + $0x38] sm:$0xff] }
   0xe   :  { %277 = vmatpush3.msra.mxu0 %v31_v11  ;;  %308 = vmatpush3.msra.mxu1 %v131_v22  ;;  %v128_v25 = vld [vmem:[%s539_s3 + $0x40] sm:$0xff]  ;;  %v126_v27 = vld [vmem:[%s539_s3 + $0x30] sm:$0xff]  ;;  %v125_v28 = vld [vmem:[%s539_s3 + $0x28] sm:$0xff] }
   0xf   :  { %278 = vmatprep.subr.mxu0 %v361_v1  ;;  %309 = vmatprep.subr.mxu1 %v361_v1  ;;  %v124_v29 = vld [vmem:[%s539_s3 + $0x20] sm:$0xff]  ;;  %v123_v30 = vld [vmem:[%s539_s3 + $0x18] sm:$0xff]  ;;  %v122_v31 = vld [vmem:[%s539_s3 + $0x10] sm:$0xff] }
  0x10   :  { %279 = vmatpush3.msra.mxu0 %v30_v12  ;;  %310 = vmatpush3.msra.mxu1 %v130_v23  ;;  %v121_v32 = vld [vmem:[%s539_s3 + $0x8] sm:$0xff]  ;;  %v120_v33 = vld [vmem:[%s539_s3] sm:$0xff] }
  0x11   :  { %280 = vmatprep.subr.mxu0 %v361_v1  ;;  %311 = vmatprep.subr.mxu1 %v361_v1  ;;  %v228_v34 = vld [vmem:[%s538_s2] ss:$0 sm:$0xff]  ;;  %s339_s2 = scalar_lea.vmem %s221_s11, 128 }
  0x12   :  { %281 = vmatpush3.msra.mxu0 %v29_v13  ;;  %312 = vmatpush3.msra.mxu1 %v129_v24  ;;  %v229_v43 = vld [vmem:[%s540_s4] ss:$0 sm:$0xff]  ;;  %p340_p0 = scmp.ne.s32.totalorder %s221_s11, %s339_s2  ;;  %p345_p2 = scmp.lt.s32.totalorder %s339_s2, %s339_s2 }
  0x13   :  { %282 = vmatprep.subr.mxu0 %v361_v1  ;;  %313 = vmatprep.subr.mxu1 %v361_v1 }
  0x14   :  { %283 = vmatpush3.msra.mxu0 %v28_v14  ;;  %314 = vmatpush3.msra.mxu1 %v128_v25  ;;  %p346_p3 = por %p345_p2, %p344_p1 }
  0x15   :  { %284 = vmatprep.subr.mxu0 %v361_v1  ;;  %315 = vmatprep.subr.mxu1 %v361_v1 }
  0x16   :  { %285 = vmatpush3.msra.mxu0 %v27_v15  ;;  %316 = vmatpush3.msra.mxu1 %v127_v26  ;;  %p347_p4 = pnand %p346_p3, %p340_p0 }
  0x17   :  { %286 = vmatprep.subr.mxu0 %v361_v1  ;;  %317 = vmatprep.subr.mxu1 %v361_v1 }
  0x18   :  { %287 = vmatpush3.msra.mxu0 %v26_v16  ;;  %318 = vmatpush3.msra.mxu1 %v126_v27 }
  0x19   :  { %288 = vmatprep.subr.mxu0 %v361_v1  ;;  %319 = vmatprep.subr.mxu1 %v361_v1 }
  0x1a   :  { %289 = vmatpush3.msra.mxu0 %v25_v17  ;;  %320 = vmatpush3.msra.mxu1 %v125_v28 }
  0x1b   :  { %290 = vmatprep.subr.mxu0 %v361_v1  ;;  %321 = vmatprep.subr.mxu1 %v361_v1 }
  0x1c   :  { %291 = vmatpush3.msra.mxu0 %v24_v18  ;;  %322 = vmatpush3.msra.mxu1 %v124_v29 }
  0x1d   :  { %292 = vmatprep.subr.mxu0 %v361_v1  ;;  %323 = vmatprep.subr.mxu1 %v361_v1 }
  0x1e   :  { %293 = vmatpush3.msra.mxu0 %v23_v19  ;;  %324 = vmatpush3.msra.mxu1 %v123_v30 }
  0x1f   :  { %294 = vmatprep.subr.mxu0 %v361_v1  ;;  %325 = vmatprep.subr.mxu1 %v361_v1 }
  0x20   :  { %295 = vmatpush3.msra.mxu0 %v22_v20  ;;  %326 = vmatpush3.msra.mxu1 %v122_v31 }
  0x21   :  { %297 = vmatmul.mubr.f32.vlgmr.msra.gmra.mxu0 %v21_v21  ;;  %327 = vmatprep.subr.mxu1 %v361_v1 }
  0x22   :  { %328 = vmatpush3.msra.mxu1 %v121_v32 }
  0x23   :  { %329 = vmatprep.subr.mxu1 %v361_v1 }
  0x24   :  { %330 = vmatpush3.msra.mxu1 %v120_v33 }
  0xe1   :  { %v111_v35 = vpop.f32.mrf.mxu0 }
  0xe2   :  { %v112_v36 = vadd.f32 %v228_v34, %v111_v35 }
  0xe3   :  { %v298_v37 = vpop.f32.mrf.mxu0 }
  0xe4   :  { %v116_v38 = vmul.f32 0.70710677, %v112_v36  ;;  %v115_v40 = vmul.f32 0.5, %v112_v36 }
  0xe6   :  { %337 = verf.f32 %v116_v38 }
  0xf3   :  { %v338_v39 = vpop.eup %337 }
  0xf4   :  { %v118_v41 = vadd.f32 1.0, %v338_v39 }
  0xf6   :  { %v119_v42 = vmul.f32 %v118_v41, %v115_v40 }
  0xf8   :  { %332 = vmatmul.mubr.f32.vlgmr.msra.gmra.mxu1 %v119_v42 }
 0x1b8   :  { %v209_v44 = vpop.f32.mrf.mxu1 }
 0x1b9   :  { %v210_v45 = vadd.f32 %v229_v43, %v209_v44 }
 0x1ba   :  { %v333_v46 = vpop.f32.mrf.mxu1 }
 0x1bb   :  { %213 = vst [vmem:[#allocation2] sm:$0xff] %v210_v45 }
 0x1bc   :  { %350 = shalt.err (!%p347_p4)
}
 0x1bd   :  { %223 = dma.vmem_to_hbm [thread:$0]  %s221_s11, 128, %s541_s5, [#allocation3]  }
 0x1be   :  { %359 = dma.done.wait [#allocation3], 128  }
 0x1bf   :  { %360 = vsyncadd [#allocation3], 4294967168 }
 0x1c0   :  { %227 = vsyncpa [#allocation3], 1 }

</bundles_post_ra>
